<compile_context>
chip_gen: v7x
topology: tpu7x:2x2x1
jax: 0.10.0
libtpu: 0.0.40
codegen_flags: <defaults>
</compile_context>

<pallas_src>
import jax
import jax.numpy as jnp
from jax.experimental import pallas as pl
from jax.experimental.pallas import tpu as pltpu


def _concept_embedding_kernel(x_ref, w_ref, b_ref, o_ref):
    # x_ref: (TM, G*F)  w_ref: (G*F, G*E)  b_ref: (1, G*E)  o_ref: (TM, G*E)
    y = jnp.dot(x_ref[...], w_ref[...], preferred_element_type=jnp.float32)
    y = y + b_ref[...].astype(jnp.float32)
    # TODO(synk): training-mode dropout (stochastic, PyTorch-RNG-dependent) is not
    # implemented; this is eval-mode dropout (identity).
    o_ref[...] = y.astype(o_ref.dtype)


# generation -> (mxu_output_lane_target, vmem_working_set_budget_bytes, vmem_limit_bytes)
_GEN_CONFIG = {
    "v5e": (128, 48 << 20, 64 << 20),   # 128-wide MXU, 128 MiB VMEM (16 MiB default scope)
    "v6e": (256, 64 << 20, 80 << 20),   # 256-wide MXU, 128 MiB VMEM
    "v7x": (256, 36 << 20, 48 << 20),   # 256-wide MXU, 64 MiB VMEM per TensorCore
    "unknown": (128, 24 << 20, 32 << 20),
}


def _tpu_generation():
    try:
        kind = jax.devices()[0].device_kind.lower().replace(" ", "")
    except Exception:  # pragma: no cover - defensive
        return "unknown"
    if "v7" in kind or "7x" in kind:
        return "v7x"
    if "v6" in kind:
        return "v6e"
    if "v5" in kind:
        return "v5e"
    return "unknown"


def concept_embedding_forward(inputs, weight, bias, *, use_bfloat16=False,
                              max_tile_rows=None):
    """Forward pass of ConceptEmbedding.

    inputs: (B, F, T) float array
    weight: (E, F)    PyTorch nn.Linear weight layout
    bias:   (E,)
    returns: (B, T, E)  (bfloat16 if use_bfloat16 else inputs.dtype)
    """
    B, F, T = inputs.shape
    E = weight.shape[0]
    M = B * T

    compute_dtype = jnp.bfloat16 if use_bfloat16 else inputs.dtype
    itemsize = jnp.dtype(compute_dtype).itemsize

    gen = _tpu_generation()
    lane_target, vmem_budget, vmem_limit = _GEN_CONFIG[gen]

    # --- lane-dense fold factor: pack G logical rows of width E into one wide MXU row ---
    if E < lane_target and lane_target % E == 0:
        G = lane_target // E
    elif E < 128 and 128 % E == 0:
        G = 128 // E
    else:
        G = 1
    # Fall back if the folded weight would eat a large fraction of the VMEM budget.
    if G > 1 and (G * F) * (G * E) * itemsize > vmem_budget // 4:
        G = 1
    Kf = G * F          # folded contraction width
    Nf = G * E          # folded (lane-dense) output width

    # --- adaptive tile size: largest row tile whose double-buffered working set fits ---
    per_row_bytes = (Kf + Nf) * itemsize
    resident_bytes = (Kf * Nf + Nf) * itemsize          # weight + bias, VMEM-resident
    tm_max = (vmem_budget - resident_bytes) // (2 * per_row_bytes)
    tm_max = max(8, min(int(tm_max), 65536))
    if max_tile_rows is not None:
        tm_max = max(8, min(tm_max, int(max_tile_rows)))
    tm_max = (tm_max // 8) * 8

    mf_needed = -(-M // G)                               # ceil(M / G)
    if mf_needed <= tm_max:
        # Single block covers all rows; only need M to be a multiple of G for the fold.
        m_pad = mf_needed * G
        mf = mf_needed
        tm = mf                                          # full-extent block (any size OK)
    else:
        # Multiple blocks: pad rows only to a multiple of 8*G (sublane alignment of the
        # folded rows); Pallas handles the partial last block via cdiv grid.
        m_pad = -(-M // (8 * G)) * (8 * G)
        mf = m_pad // G
        tm = tm_max

    # --- glue: row-major reshape identical to torch.reshape(-1, F) ---
    x2d = inputs.reshape(M, F).astype(compute_dtype)
    if m_pad > M:
        x2d = jnp.pad(x2d, ((0, m_pad - M), (0, 0)))
    x_folded = x2d.reshape(mf, Kf)

    w_fe = weight.T.astype(compute_dtype)                # (F, E)
    if G > 1:
        # Block-diagonal (G*F, G*E): block (g, h) == w_fe iff g == h, else 0.
        w_folded = jnp.kron(jnp.eye(G, dtype=compute_dtype), w_fe)
        b_folded = jnp.tile(bias.astype(compute_dtype), (G,)).reshape(1, Nf)
    else:
        w_folded = w_fe
        b_folded = bias.astype(compute_dtype).reshape(1, Nf)

    grid = (pl.cdiv(mf, tm),)

    out_folded = pl.pallas_call(
        _concept_embedding_kernel,
        out_shape=jax.ShapeDtypeStruct((mf, Nf), compute_dtype),
        grid=grid,
        in_specs=[
            pl.BlockSpec((tm, Kf), lambda i: (i, 0)),    # x tiles stream over rows
            pl.BlockSpec((Kf, Nf), lambda i: (0, 0)),    # weight stays VMEM-resident
            pl.BlockSpec((1, Nf), lambda i: (0, 0)),     # bias stays VMEM-resident
        ],
        out_specs=pl.BlockSpec((tm, Nf), lambda i: (i, 0)),
        compiler_params=pltpu.CompilerParams(
            dimension_semantics=("parallel",),
            vmem_limit_bytes=vmem_limit,
        ),
        cost_estimate=pl.CostEstimate(
            flops=2 * mf * Kf * Nf,
            bytes_accessed=itemsize * (mf * Kf + Kf * Nf + Nf + mf * Nf),
            transcendentals=0,
        ),
    )(x_folded, w_folded, b_folded)

    # Folded HBM layout (mf, G*E) row-major == (mf*G, E) row-major.
    out2d = out_folded.reshape(m_pad, E)
    if m_pad > M:
        out2d = out2d[:M]                                # only when padding was added
    return out2d.reshape(B, T, E)


if __name__ == "__main__":
    # Small shapes consistent with the module: batch=2, num_features=4,
    # time_steps=8, embedding_size=32.
    B, F, T, E = 2, 4, 8, 32

    key = jax.random.PRNGKey(0)
    k_x, k_w, k_b = jax.random.split(key, 3)

    inputs = jax.random.normal(k_x, (B, F, T), dtype=jnp.float32)
    # Deterministic "parameters" (nn.Linear(F, E): weight (E, F), bias (E,)).
    weight = jax.random.normal(k_w, (E, F), dtype=jnp.float32) * 0.1
    bias = jax.random.normal(k_b, (E,), dtype=jnp.float32) * 0.1

    out = concept_embedding_forward(inputs, weight, bias)
    out = jax.block_until_ready(out)

    # Pure-JAX reference (matches the PyTorch module's eval-mode forward exactly,
    # including the raw (B, F, T) -> (B*T, F) reshape).
    ref = (inputs.reshape(-1, F) @ weight.T + bias).reshape(B, T, E)
    assert out.shape == (B, T, E)
    assert jnp.allclose(out, ref, atol=1e-5, rtol=1e-5), float(jnp.max(jnp.abs(out - ref)))

    print("KERNEL_OK")
</pallas_src>

<mosaic_0001>
module attributes {stable_mosaic.version = 11 : i64} {
  func.func @_concept_embedding_kernel(%arg0: i32, %arg1: memref<4x16xf32, #tpu.memory_space<vmem>>, %arg2: memref<16x128xf32, #tpu.memory_space<vmem>>, %arg3: memref<1x128xf32, #tpu.memory_space<vmem>>, %arg4: memref<4x128xf32, #tpu.memory_space<vmem>>) attributes {dimension_semantics = [#tpu.dimension_semantics<parallel>], iteration_bounds = array<i64: 1>, scalar_prefetch = 0 : i64, scratch_operands = 0 : i64, tpu.core_type = #tpu.core_type<tc>, window_params = [{transform_indices = @transform_0, window_bounds = array<i64: 4, 16>}, {pipeline_mode = #tpu.pipeline_mode<synchronous>, transform_indices = @transform_1, window_bounds = array<i64: 16, 128>}, {pipeline_mode = #tpu.pipeline_mode<synchronous>, transform_indices = @transform_2, window_bounds = array<i64: 1, 128>}, {transform_indices = @transform_3, window_bounds = array<i64: 4, 128>}]} {
    %c0 = arith.constant 0 : index
    %c0_0 = arith.constant 0 : index
    %0 = vector.load %arg1[%c0, %c0_0] : memref<4x16xf32, #tpu.memory_space<vmem>>, vector<4x16xf32>
    %c0_1 = arith.constant 0 : index
    %c0_2 = arith.constant 0 : index
    %1 = vector.load %arg2[%c0_1, %c0_2] : memref<16x128xf32, #tpu.memory_space<vmem>>, vector<16x128xf32>
    %cst = arith.constant dense<0.000000e+00> : vector<4x128xf32>
    %2 = tpu.matmul %0, %1, %cst {dimension_numbers = #tpu.dot_dimension_numbers<[1], [0], [0], [1], [0, 0, 1, 1], [], []>} : vector<4x16xf32>, vector<16x128xf32>, vector<4x128xf32> -> vector<4x128xf32>
    %c0_3 = arith.constant 0 : index
    %c0_4 = arith.constant 0 : index
    %3 = vector.load %arg3[%c0_3, %c0_4] : memref<1x128xf32, #tpu.memory_space<vmem>>, vector<1x128xf32>
    %4 = vector.broadcast %3 : vector<1x128xf32> to vector<4x128xf32>
    %5 = arith.addf %2, %4 : vector<4x128xf32>
    %c0_5 = arith.constant 0 : index
    %c0_6 = arith.constant 0 : index
    %6 = vector.load %arg4[%c0_5, %c0_6] : memref<4x128xf32, #tpu.memory_space<vmem>>, vector<4x128xf32>
    tpu.vector_store %arg4[%c0_5, %c0_6], %5 {strides = array<i32>} : memref<4x128xf32, #tpu.memory_space<vmem>>, vector<4x128xf32>,
    return
  }
  func.func @transform_0(%arg0: i32) -> (i32, i32) {
    %c0_i32 = arith.constant 0 : i32
    %c0_i32_0 = arith.constant 0 : i32
    return %arg0, %c0_i32 : i32, i32
  }
  func.func @transform_1(%arg0: i32) -> (i32, i32) {
    %c0_i32 = arith.constant 0 : i32
    %c0_i32_0 = arith.constant 0 : i32
    %c0_i32_1 = arith.constant 0 : i32
    return %c0_i32, %c0_i32_0 : i32, i32
  }
  func.func @transform_2(%arg0: i32) -> (i32, i32) {
    %c0_i32 = arith.constant 0 : i32
    %c0_i32_0 = arith.constant 0 : i32
    %c0_i32_1 = arith.constant 0 : i32
    return %c0_i32, %c0_i32_0 : i32, i32
  }
  func.func @transform_3(%arg0: i32) -> (i32, i32) {
    %c0_i32 = arith.constant 0 : i32
    %c0_i32_0 = arith.constant 0 : i32
    return %arg0, %c0_i32 : i32, i32
  }
}

</mosaic_0001>

<bundles_post_ra>
// kernel: tpu_custom_call.1
= control target key start
LH: loop header
LB: loop body
LE: loop exit
PB: predicated region body
PF: predicated region fallthrough
CT: control target
= control target key end

     0   :  { %8 = vsyncpa [#allocation3], 0  ;;  %s311_s0 = inlined_call_operand.hbm [shape: f32[4,16], index: 0, kind: input, shape index: {}]   ;;  %s312_s1 = inlined_call_operand.hbm [shape: f32[16,128], index: 1, kind: input, shape index: {}]   ;;  %s313_s2 = inlined_call_operand.vmem [shape: f32[1,128], index: 2, kind: input, shape index: {}]   ;;  %s314_s3 = inlined_call_operand.hbm [shape: f32[4,128], index: 3, kind: output, shape index: {}]  }
   0x1   :  { %9 = vsyncpa [#allocation6], 0 }
   0x2   :  { %10 = vsyncpa [#allocation4], 0  ;;  %s237_s12 = smov [#allocation2]   ;;  %s238_s14 = smov [#allocation5]  }
   0x3   :  { %s17_s13 = sshll.u32 %s237_s12, 4  ;;  %s26_s15 = sshll.u32 %s238_s14, 4  ;;  %s18_s13 = int_to_ptr.vmem [resolvable:$true] %s17_s13  ;;  %s265_s15 = int_to_ptr.vmem [resolvable:$true] %s26_s15 }
   0x4   :  { %s165_s18 = scalar_lea.hbm %s311_s0, 64 }
   0x5   :  { %p166_p0 = scmp.ne.s32.totalorder %s311_s0, %s165_s18  ;;  %p169_p1 = scmp.lt.u32.totalorder %s165_s18, %s311_s0 }
   0x7   :  { %p171_p2 = pnand %p169_p1, %p166_p0 }
   0x9   :  { %174 = shalt.err (!%p171_p2)
}
   0xa   :  { %s175_s23 = scalar_lea.vmem %s18_s13, 64  ;;  %p180_p4 = scmp.lt.s32.totalorder %s18_s13, %s18_s13 }
   0xb   :  { %p176_p3 = scmp.ne.s32.totalorder %s18_s13, %s175_s23  ;;  %p181_p5 = scmp.lt.s32.totalorder %s175_s23, %s175_s23 }
   0xd   :  { %p182_p6 = por %p181_p5, %p180_p4 }
   0xf   :  { %p183_p7 = pnand %p182_p6, %p176_p3 }
  0x11   :  { %186 = shalt.err (!%p183_p7)
}
  0x12   :  { %20 = dma.hbm_to_vmem [thread:$0]  %s311_s0, 64, %s18_s13, [#allocation3]  }
  0x13   :  { %s187_s28 = scalar_lea.hbm %s312_s1, 256 }
  0x14   :  { %p188_p8 = scmp.ne.s32.totalorder %s312_s1, %s187_s28  ;;  %p191_p9 = scmp.lt.u32.totalorder %s187_s28, %s312_s1 }
  0x16   :  { %p193_p10 = pnand %p191_p9, %p188_p8 }
  0x18   :  { %196 = shalt.err (!%p193_p10)
}
  0x19   :  { %s197_s6 = scalar_lea.vmem %s265_s15, 256  ;;  %p202_p12 = scmp.lt.s32.totalorder %s265_s15, %s265_s15 }
  0x1a   :  { %p198_p11 = scmp.ne.s32.totalorder %s265_s15, %s197_s6  ;;  %p203_p13 = scmp.lt.s32.totalorder %s197_s6, %s197_s6 }
  0x1c   :  { %p204_p0 = por %p203_p13, %p202_p12 }
  0x1e   :  { %p205_p1 = pnand %p204_p0, %p198_p11 }
  0x20   :  { %208 = shalt.err (!%p205_p1)
}
  0x21   :  { %s239_s0 = smov 128   ;;  %s240_s7 = smov 8  }
  0x22   :  { %32 = dma.hbm_to_vmem [thread:$0]  %s312_s1, 256, %s265_s15, [#allocation6], %s239_s0, %s239_s0, %s240_s7  }
  0x23   :  { %231 = dma.done.wait [#allocation3], 64  }
  0x24   :  { %232 = vsyncadd [#allocation3], 4294967232 }
  0x25   :  { %233 = dma.done.wait [#allocation6], 256  }
  0x26   :  { %234 = vsyncadd [#allocation6], 4294967040  ;;  %v241_v0 = vmov 0.0|0.0   ;;  %vm242_vm0 = vmmov 0   ;;  %v243_v1 = vmov 0.0   ;;  %v42_v2 = vld [vmem:[#allocation5] sm:$0xff] }
  0x27   :  { %154 = vmatprep.subr.bf16.mxu0 %v241_v0  ;;  %151 = vmatprep.mubr.msk.f32.mxu0 %vm242_vm0, %v243_v1  ;;  %v43_v3 = vld [vmem:[#allocation5 + $0x8] sm:$0xff]  ;;  %v41_v5 = vld [vmem:[#allocation2] sm:$0xf]  ;;  %vm51_vm1 = vcmask 130048   ;;  %s244_s1 = smov [#allocation7]  }
  0x28   :  { %v155_v4 = vpack.c.bf16 %v43_v3, %v42_v2  ;;  %v142_v6 = vld [vmem:[%s313_s2] ss:$0 sm:$0xff]  ;;  %s132_s12 = sshll.u32 %s244_s1, 4  ;;  %s133_s12 = int_to_ptr.vmem [resolvable:$true] %s132_s12 }
  0x29   :  { %s209_s13 = scalar_lea.vmem %s133_s12, 64  ;;  %p214_p3 = scmp.lt.s32.totalorder %s133_s12, %s133_s12 }
  0x2a   :  { %156 = vmatpush3.bf16.msra.mxu0 %v155_v4  ;;  %p210_p2 = scmp.ne.s32.totalorder %s133_s12, %s209_s13  ;;  %p215_p4 = scmp.lt.s32.totalorder %s209_s13, %s209_s13 }
  0x2c   :  { %p216_p5 = por %p215_p4, %p214_p3 }
  0x2d   :  { %152 = vmatmul.mubr.msk.f32.vlgmr.msra.gmra.mrb[0].mxu0 %vm51_vm1, %v41_v5 }
  0x2e   :  { %p217_p6 = pnand %p216_p5, %p210_p2 }
 0x100   :  { %v121_v7 = vpop.f32.mrb[0].mxu0 }
 0x101   :  { %v122_v8 = vadd.f32 %v142_v6, %v121_v7  ;;  %v153_v9 = vpop.f32.mrb[1].mxu0 }
 0x103   :  { %125 = vst [vmem:[#allocation7] sm:$0xf] %v122_v8 }
 0x104   :  { %220 = shalt.err (!%p217_p6)
}
 0x105   :  { %s221_s16 = scalar_lea.hbm %s314_s3, 64 }
 0x106   :  { %p222_p7 = scmp.ne.s32.totalorder %s314_s3, %s221_s16  ;;  %p225_p8 = scmp.lt.u32.totalorder %s221_s16, %s314_s3 }
 0x108   :  { %p227_p9 = pnand %p225_p8, %p222_p7 }
 0x10a   :  { %230 = shalt.err (!%p227_p9)
}
 0x10b   :  { %135 = dma.vmem_to_hbm [thread:$0]  %s133_s12, 64, %s314_s3, [#allocation4]  }
 0x10c   :  { %235 = dma.done.wait [#allocation4], 64  }
 0x10d   :  { %236 = vsyncadd [#allocation4], 4294967232 }
 0x10e   :  { %139 = vsyncpa [#allocation3], 1 }
 0x10f   :  { %140 = vsyncpa [#allocation6], 1 }
 0x110   :  { %141 = vsyncpa [#allocation4], 1 }

</bundles_post_ra>
